<compile_context>
chip_gen: v7x
topology: tpu7x:2x2x1
jax: 0.10.0
libtpu: 0.0.40
codegen_flags: <defaults>
</compile_context>

<pallas_src>
import math

import jax
import jax.numpy as jnp
from jax.experimental import pallas as pl
from jax.experimental.pallas import tpu as pltpu


def _cdiv(a, b):
    return -(-a // b)


def _round_up(a, b):
    return _cdiv(a, b) * b


def _down1d_kernel(x_ref, w_ref, b_ref, o_ref):
    # x_ref: (TL, 3*C)  im2col rows: taps (2r-1, 2r, 2r+1) concatenated along channels
    # w_ref: (3*C, C)   concat([w_tap0, w_tap1, w_tap2]) along C_in
    # b_ref: (1, C)     bias (f32)
    # o_ref: (TL, C)
    acc = jnp.dot(x_ref[...], w_ref[...], preferred_element_type=jnp.float32)
    o_ref[...] = (acc + b_ref[...]).astype(o_ref.dtype)


def _vmem_budget_bytes():
    """Generation-aware scoped-VMEM budget (also used as vmem_limit_bytes)."""
    cap = None
    try:
        cap = int(getattr(pltpu.get_tpu_info(), "vmem_capacity_bytes", 0)) or None
    except Exception:  # info unavailable at trace time -> be conservative
        cap = None
    if cap is None:
        cap = 64 << 20                       # assume the smallest (v7x-sized) VMEM
    if cap <= (64 << 20):                    # v7x: 64 MiB/TC -> leave compiler headroom
        budget = min(cap - (16 << 20), 48 << 20)
    else:                                    # v5e / v6e: 128 MiB physical
        budget = min(cap - (24 << 20), 100 << 20)
    return max(budget, 16 << 20)


def _pick_l_tile(l_out, c_pad, in_itemsize, out_itemsize, budget_bytes):
    """Largest L_out tile whose double-buffered working set fits the budget."""
    # Per grid step (default pipeline double-buffers everything):
    #   2 x (TL, 3*C) input + 2 x (TL, C) output + 2 x [(3C, C) weight + (8, C) bias]
    w_bytes = 2 * (3 * c_pad * c_pad * in_itemsize + 8 * c_pad * 4)
    per_row = 2 * (3 * c_pad * in_itemsize + c_pad * out_itemsize)
    avail = max(budget_bytes - w_bytes, 1 << 20)
    tl = avail // per_row
    min_align = 16 if in_itemsize < 4 else 8      # bf16 sublane packing vs f32
    if tl >= 2048:
        tl = 2048                                 # amortizes ~0.35 us/step overhead
    elif tl >= 256:
        tl = tl // 256 * 256                      # keep MXU passes full-height
    else:
        tl = max(min_align, tl // min_align * min_align)
    return int(min(tl, _round_up(l_out, 8)))      # never exceed the data extent


def downsample1d(x, weight, bias, *, compute_dtype=None, out_dtype=None):
    """Conv1d(dim, dim, kernel=3, stride=2, padding=1), PyTorch semantics.

    x: (N, C, L); weight: (C_out, C_in, 3) [PyTorch OIK]; bias: (C,).
    compute_dtype: MXU operand dtype. bf16 is recommended on v5e/v6e/v7x (the kernel
      is HBM-bound, so halving operand bytes nearly halves kernel-body time);
      accumulation is always f32. Results then differ from f32 at the ~1e-2 level.
    out_dtype: output dtype (default x.dtype). Returns (N, C, L_out).
    """
    n, c, l = x.shape
    c_o, c_i, k = weight.shape
    assert c == c_i == c_o and k == 3
    stride, pad = 2, 1
    l_out = (l + 2 * pad - k) // stride + 1

    cdt = jnp.dtype(compute_dtype) if compute_dtype is not None else x.dtype
    odt = jnp.dtype(out_dtype) if out_dtype is not None else x.dtype
    c_pad = _round_up(c, 128)                      # lane-dense channels

    # ---- layout glue (a real model would keep activations NLC + padded already) ----
    # TODO(synk): fold the NCL<->NLC transposes, channel pad and im2col build into
    # producer/consumer ops (or allow_input_fusion) to kill these extra HBM passes.
    x_nlc = jnp.transpose(x, (0, 2, 1))            # (N, L, C)
    if c_pad != c:
        x_nlc = jnp.pad(x_nlc, ((0, 0), (0, 0), (0, c_pad - c)))
    # Padded position p maps to original p-1; output row r needs padded 2r .. 2r+2.
    pad_r = 2 * l_out + 1 - l                      # >= 1 for every valid L
    xpad = jnp.pad(x_nlc, ((0, 0), (1, pad_r), (0, 0)))           # (N, 2*l_out+2, C)
    t0 = xpad[:, 0:2 * l_out:2, :]                 # tap 0 -> original 2r-1
    t1 = xpad[:, 1:2 * l_out + 1:2, :]             # tap 1 -> original 2r
    t2 = xpad[:, 2:2 * l_out + 2:2, :]             # tap 2 -> original 2r+1
    x3 = jnp.concatenate([t0, t1, t2], axis=-1).astype(cdt)       # (N, l_out, 3*C)

    # weights: (C_out, C_in, K) -> per-tap (C_in, C_out), padded, packed to (3*C, C)
    w_taps = jnp.transpose(weight, (2, 1, 0))      # (K, C_in, C_out)
    if c_pad != c:
        w_taps = jnp.pad(w_taps, ((0, 0), (0, c_pad - c), (0, c_pad - c)))
    w3 = jnp.concatenate([w_taps[0], w_taps[1], w_taps[2]], axis=0).astype(cdt)
    b2 = bias if c_pad == c else jnp.pad(bias, (0, c_pad - c))
    b2 = b2.reshape(1, c_pad).astype(jnp.float32)

    in_is = jnp.dtype(cdt).itemsize
    out_is = jnp.dtype(odt).itemsize
    budget = _vmem_budget_bytes()
    tl = _pick_l_tile(l_out, c_pad, in_is, out_is, budget)

    # v7x has 2 TensorCores: if batch alone cannot feed both, split L_out evenly.
    if n == 1 and l_out > 8:
        steps = _cdiv(l_out, tl)
        if steps < 2 or steps % 2 == 1:
            steps = max(2, steps + (steps % 2))
            tl = min(tl, max(8, _round_up(_cdiv(l_out, steps), 8)))

    grid = (n, pl.cdiv(l_out, tl))

    out_nlc = pl.pallas_call(
        _down1d_kernel,
        out_shape=jax.ShapeDtypeStruct((n, l_out, c_pad), odt),
        grid=grid,
        in_specs=[
            pl.BlockSpec((None, tl, 3 * c_pad), lambda b, i: (b, i, 0)),
            # Constant-index blocks: the pipeline DMAs them once and re-uses them.
            # (pl.Buffered(1) would halve their residency; budget accounts for 2x.)
            pl.BlockSpec((3 * c_pad, c_pad), lambda b, i: (0, 0)),
            pl.BlockSpec((1, c_pad), lambda b, i: (0, 0)),
        ],
        out_specs=pl.BlockSpec((None, tl, c_pad), lambda b, i: (b, i, 0)),
        compiler_params=pltpu.CompilerParams(
            dimension_semantics=("parallel", "parallel"),
            vmem_limit_bytes=int(budget),
        ),
    )(x3, w3, b2)

    out_nlc = out_nlc[:, :, :c] if c_pad != c else out_nlc
    return jnp.transpose(out_nlc, (0, 2, 1))       # back to NCL


def init_params(key, dim, k=3):
    # PyTorch Conv1d default init: U(-1/sqrt(fan_in), 1/sqrt(fan_in)) for w and b.
    fan_in = dim * k
    bound = math.sqrt(1.0 / fan_in)
    kw, kb = jax.random.split(key)
    weight = jax.random.uniform(kw, (dim, dim, k), jnp.float32, -bound, bound)
    bias = jax.random.uniform(kb, (dim,), jnp.float32, -bound, bound)
    return weight, bias


if __name__ == "__main__":
    key = jax.random.PRNGKey(0)
    k_x, k_p = jax.random.split(key)

    N, DIM, L = 2, 4, 16
    x = jax.random.normal(k_x, (N, DIM, L), jnp.float32)
    weight, bias = init_params(k_p, DIM)

    # Reference: XLA conv with the same semantics as torch.nn.Conv1d(dim, dim, 3, 2, 1).
    ref = jax.lax.conv_general_dilated(
        x, weight, window_strides=(2,), padding=((1, 1),),
        dimension_numbers=("NCH", "OIH", "NCH"),
    ) + bias[None, :, None]

    out = jax.block_until_ready(downsample1d(x, weight, bias))
    assert out.shape == (N, DIM, (L + 2 - 3) // 2 + 1)
    assert jnp.allclose(out, ref, atol=1e-5, rtol=1e-5)

    # bf16 MXU operands + bf16 output (recommended path on v5e/v6e/v7x; f32 accumulation).
    out_bf16 = jax.block_until_ready(
        downsample1d(x, weight, bias, compute_dtype=jnp.bfloat16,
                     out_dtype=jnp.bfloat16))
    assert out_bf16.shape == out.shape and out_bf16.dtype == jnp.bfloat16
    assert jnp.allclose(out_bf16.astype(jnp.float32), ref, atol=5e-2, rtol=5e-2)

    print("KERNEL_OK")
</pallas_src>

<mosaic_0001>
module attributes {stable_mosaic.version = 11 : i64} {
  func.func @_down1d_kernel(%arg0: i32, %arg1: i32, %arg2: memref<1x8x384xf32, #tpu.memory_space<vmem>>, %arg3: memref<384x128xf32, #tpu.memory_space<vmem>>, %arg4: memref<1x128xf32, #tpu.memory_space<vmem>>, %arg5: memref<1x8x128xf32, #tpu.memory_space<vmem>>) attributes {dimension_semantics = [#tpu.dimension_semantics<parallel>, #tpu.dimension_semantics<parallel>], iteration_bounds = array<i64: 2, 1>, scalar_prefetch = 0 : i64, scratch_operands = 0 : i64, tpu.core_type = #tpu.core_type<tc>, window_params = [{transform_indices = @transform_0, window_bounds = array<i64: 1, 8, 384>}, {pipeline_mode = #tpu.pipeline_mode<synchronous>, transform_indices = @transform_1, window_bounds = array<i64: 384, 128>}, {pipeline_mode = #tpu.pipeline_mode<synchronous>, transform_indices = @transform_2, window_bounds = array<i64: 1, 128>}, {transform_indices = @transform_3, window_bounds = array<i64: 1, 8, 128>}]} {
    %c0 = arith.constant 0 : index
    %c0_0 = arith.constant 0 : index
    %c0_1 = arith.constant 0 : index
    %0 = vector.load %arg2[%c0, %c0_0, %c0_1] : memref<1x8x384xf32, #tpu.memory_space<vmem>>, vector<1x8x384xf32>
    %1 = vector.shape_cast %0 : vector<1x8x384xf32> to vector<8x384xf32>
    %c0_2 = arith.constant 0 : index
    %c0_3 = arith.constant 0 : index
    %2 = vector.load %arg3[%c0_2, %c0_3] : memref<384x128xf32, #tpu.memory_space<vmem>>, vector<384x128xf32>
    %cst = arith.constant dense<0.000000e+00> : vector<8x128xf32>
    %3 = tpu.matmul %1, %2, %cst {dimension_numbers = #tpu.dot_dimension_numbers<[1], [0], [0], [1], [0, 0, 1, 1], [], []>} : vector<8x384xf32>, vector<384x128xf32>, vector<8x128xf32> -> vector<8x128xf32>
    %c0_4 = arith.constant 0 : index
    %c0_5 = arith.constant 0 : index
    %4 = vector.load %arg4[%c0_4, %c0_5] : memref<1x128xf32, #tpu.memory_space<vmem>>, vector<1x128xf32>
    %5 = vector.broadcast %4 : vector<1x128xf32> to vector<8x128xf32>
    %6 = arith.addf %3, %5 : vector<8x128xf32>
    %c0_6 = arith.constant 0 : index
    %c0_7 = arith.constant 0 : index
    %c0_8 = arith.constant 0 : index
    %7 = vector.load %arg5[%c0_6, %c0_7, %c0_8] : memref<1x8x128xf32, #tpu.memory_space<vmem>>, vector<1x8x128xf32>
    %8 = vector.shape_cast %7 : vector<1x8x128xf32> to vector<8x128xf32>
    %9 = vector.shape_cast %6 : vector<8x128xf32> to vector<1x8x128xf32>
    tpu.vector_store %arg5[%c0_6, %c0_7, %c0_8], %9 {strides = array<i32>} : memref<1x8x128xf32, #tpu.memory_space<vmem>>, vector<1x8x128xf32>,
    return
  }
  func.func @transform_0(%arg0: i32, %arg1: i32) -> (i32, i32, i32) {
    %c0_i32 = arith.constant 0 : i32
    %c0_i32_0 = arith.constant 0 : i32
    return %arg0, %arg1, %c0_i32 : i32, i32, i32
  }
  func.func @transform_1(%arg0: i32, %arg1: i32) -> (i32, i32) {
    %c0_i32 = arith.constant 0 : i32
    %c0_i32_0 = arith.constant 0 : i32
    %c0_i32_1 = arith.constant 0 : i32
    return %c0_i32, %c0_i32_0 : i32, i32
  }
  func.func @transform_2(%arg0: i32, %arg1: i32) -> (i32, i32) {
    %c0_i32 = arith.constant 0 : i32
    %c0_i32_0 = arith.constant 0 : i32
    %c0_i32_1 = arith.constant 0 : i32
    return %c0_i32, %c0_i32_0 : i32, i32
  }
  func.func @transform_3(%arg0: i32, %arg1: i32) -> (i32, i32, i32) {
    %c0_i32 = arith.constant 0 : i32
    %c0_i32_0 = arith.constant 0 : i32
    return %arg0, %arg1, %c0_i32 : i32, i32, i32
  }
}

</mosaic_0001>

<bundles_post_ra>
// kernel: tpu_custom_call.1
= control target key start
LH: loop header
LB: loop body
LE: loop exit
PB: predicated region body
PF: predicated region fallthrough
CT: control target
= control target key end

     0   :  { %8 = vsyncpa [#allocation3], 0  ;;  %s1163_s0 = inlined_call_operand.hbm [shape: f32[2,8,384], index: 0, kind: input, shape index: {}]   ;;  %s1164_s1 = inlined_call_operand.hbm [shape: f32[384,128], index: 1, kind: input, shape index: {}]   ;;  %s1165_s2 = inlined_call_operand.vmem [shape: f32[1,128], index: 2, kind: input, shape index: {}]   ;;  %s1166_s3 = inlined_call_operand.hbm [shape: f32[2,8,128], index: 3, kind: output, shape index: {}]  }
   0x1   :  { %10 = vsyncpa [#allocation3 + $0x1], 0 }
   0x2   :  { %11 = vsyncpa [#allocation6], 0 }
   0x3   :  { %12 = vsyncpa [#allocation4], 0 }
   0x4   :  { %14 = vsyncpa [#allocation4 + $0x1], 0  ;;  %s938_s12 = smov 0   ;;  %s940_s13 = smov 0  }
   0x5   :  { %s942_s14 = smov 0   ;;  %s944_s15 = smov 0  }
   0x6   :  { %s946_s16 = smov 0   ;;  %s948_s17 = smov 0  }
   0x7 LB: > { %s526_s18 = sadd.s32 4294967295, %s908_s17   ;;  %s527_s19 = sadd.s32 4294967294, %s908_s17   ;;  %s908_s17 = sphi %s948_s17, %s20_s17   ;;  %s904_s16 = sphi %s946_s16, %s1189_s16   ;;  %s900_s15 = sphi %s944_s15, %s1188_s15   ;;  %s896_s14 = sphi %s942_s14, %s1187_s14   ;;  %s892_s13 = sphi %s940_s13, %s1186_s13   ;;  %s888_s12 = sphi %s938_s12, %s1185_s12  }
   0x8   : > { %p54_p0 = scmp.ne.s32.totalorder %s892_s13, %s888_s12  ;;  %p972_p1 = scmp.eq.s32.totalorder %s526_s18, 0 }
   0x9   : > { %p976_p2 = scmp.eq.s32.totalorder %s526_s18, 1  ;;  %p128_p3 = scmp.eq.s32.totalorder %s527_s19, 1 }
   0xa   : > { %s1171_s20 = scalar_select %p972_p1, 1, 0 }
   0xb   : > { %s1172_s21 = scalar_select %p976_p2, 1, 0 }
   0xc   : > { %p982_p4 = por %p972_p1, %p54_p0  ;;  %p528_p5 = scmp.ge.s32.totalorder %s908_s17, 1 }
   0xd   : > { %p987_p6 = por %p128_p3, %p54_p0  ;;  %p135_p7 = scmp.lt.s32.totalorder %s908_s17, 3 }
   0xe   : > { %s1173_s22 = scalar_select %p982_p4, 1, 0 }
   0xf   : > { %s1174_s23 = scalar_select %p987_p6, 1, 0 }
  0x10   : > { %p992_p8 = pnand %p528_p5, %p135_p7  ;;  %s910_s25 = smov [#allocation5]  }
  0x11   : > { %s147_s26 = sshll.u32 %s910_s25, 4  ;;  %s32_s28 = sadd.s32 1, %s904_s16  ;;  %s148_s26 = int_to_ptr.vmem [resolvable:$true] %s147_s26 }
  0x12   : > { %s1175_s24 = scalar_select %p992_p8, 1, 0 }
  0x13   : > { %p694_p9 = pneg %p992_p8  ;;  %s764_s4 = scalar_lea.hbm %s1164_s1, 6144 }
  0x14   : > { %p765_p12 = scmp.ne.s32.totalorder %s1164_s1, %s764_s4  ;;  %p771_p5 = scmp.lt.u32.totalorder %s764_s4, %s1164_s1 }
  0x15   : > { %p1001_p11 = pnand %p694_p9, %p972_p1 }
  0x17   : > { %p766_p13 = pneg %p1001_p11 }
  0x19   : > { %p767_p0 = pnand %p766_p13, %p765_p12 }
  0x1b   : > { %p768_p3 = pneg %p767_p0 }
  0x1d   : > { %p773_p7 = pnand %p771_p5, %p768_p3 }
  0x1f   : > { %776 = shalt.err (!%p773_p7)
}
  0x20   : > { %s777_s9 = scalar_lea.vmem %s148_s26, 6144  ;;  %p785_p1 = scmp.lt.s32.totalorder %s148_s26, %s148_s26 }
  0x21   : > { %p778_p9 = scmp.ne.s32.totalorder %s148_s26, %s777_s9  ;;  %p786_p4 = scmp.lt.s32.totalorder %s777_s9, %s777_s9 }
  0x23   : > { %p780_p10 = pnand %p778_p9, %p766_p13  ;;  %p787_p8 = por %p786_p4, %p785_p1 }
  0x25   : > { %p781_p6 = pneg %p780_p10 }
  0x27   : > { %p788_p2 = pnand %p787_p8, %p781_p6 }
  0x29   : > { %791 = shalt.err (!%p788_p2)
}
  0x2a   : > { %s911_s10 = smov 128   ;;  %s912_s11 = smov 8  }
  0x2b   : > { %697 = dma.hbm_to_vmem [thread:$0]  (!%p1001_p11), %s1164_s1, 6144, %s148_s26, [#allocation6], %s911_s10, %s911_s10, %s912_s11  }
  0x2c   : > { %p34_p1 = scmp.ge.s32.totalorder %s32_s28, 2  ;;  %s41_s25 = sadd.s32 1, %s896_s14 }
  0x2d   : > { %p48_p2 = scmp.ne.s32.totalorder %s896_s14, %s892_s13  ;;  %p49_p4 = scmp.eq.s32.totalorder %s908_s17, 0 }
  0x2e   : > { %s1191_s28 = smov (%p34_p1, %s32_s28), 0  ;;  %p1177_p8 = scmp.ne.s32.totalorder %s1172_s21, 0 }
  0x2f   : > { %p50_p6 = por %p49_p4, %p48_p2  ;;  %s36_s30 = ssub.s32 %s904_s16, %s1191_s28 }
  0x30   : > { %p1030_p10 = por %p1177_p8, %p48_p2  ;;  %p707_p12 = scmp.lt.s32.totalorder %s908_s17, 2 }
  0x31   : > { %p39_p13 = scmp.eq.s32.totalorder %s36_s30, 0  ;;  %s164_s27 = sand.u32 1, %s896_s14  }
  0x32   : > { %s683_s4 = smul.u32 24, %s164_s27  ;;  %p1042_p11 = pnand %p707_p12, %p50_p6 }
  0x33   : > { %s1039_s5 = scalar_select %p39_p13, %s896_s14, %s41_s25  }
  0x34   : > { %s684_s26 = smul.u32 384, %s904_s16  ;;  %s168_s6 = scalar_lea.vmem [#allocation2], %s683_s4 }
  0x35   : > { %s178_s7 = sshll.u32 %s168_s6, 4  ;;  %s165_s11 = scalar_lea.sflag [#allocation3], %s164_s27  ;;  %s1051_s7 = int_to_ptr.vmem [resolvable:$true] %s178_s7 }
  0x36   : > { %s1049_s10 = scalar_lea.hbm %s1163_s0, %s684_s26  ;;  %p794_p3 = pneg %p1042_p11 }
  0x37   : > { %s792_s18 = scalar_lea.hbm %s1049_s10, 384  ;;  %s797_s30 = scalar_lea.hbm %s1163_s0, 768 }
  0x38   : > { %p793_p0 = scmp.ne.s32.totalorder %s1049_s10, %s792_s18  ;;  %p798_p9 = scmp.lt.u32.totalorder %s1049_s10, %s1163_s0 }
  0x39   : > { %p799_p1 = scmp.lt.u32.totalorder %s797_s30, %s792_s18  ;;  %p801_p4 = scmp.lt.u32.totalorder %s792_s18, %s1049_s10 }
  0x3a   : > { %p795_p5 = pnand %p794_p3, %p793_p0 }
  0x3b   : > { %p800_p2 = por %p799_p1, %p798_p9 }
  0x3c   : > { %p796_p7 = pneg %p795_p5 }
  0x3d   : > { %p802_p6 = por %p801_p4, %p800_p2 }
  0x3f   : > { %p803_p8 = pnand %p802_p6, %p796_p7 }
  0x41   : > { %806 = shalt.err (!%p803_p8)
}
  0x42   : > { %s807_s27 = scalar_lea.vmem %s1051_s7, 384  ;;  %s913_s6 = smov [#allocation2]  }
  0x43   : > { %p808_p12 = scmp.ne.s32.totalorder %s1051_s7, %s807_s27  ;;  %s812_s9 = sshll.u32 %s913_s6, 4  ;;  %s813_s9 = int_to_ptr.vmem [resolvable:$false] %s812_s9 }
  0x44   : > { %s814_s21 = scalar_lea.vmem %s813_s9, 768  ;;  %p815_p5 = scmp.lt.s32.totalorder %s1051_s7, %s813_s9 }
  0x45   : > { %p810_p13 = pnand %p808_p12, %p794_p3  ;;  %p816_p9 = scmp.lt.s32.totalorder %s814_s21, %s807_s27 }
  0x47   : > { %p811_p0 = pneg %p810_p13  ;;  %p817_p1 = por %p816_p9, %p815_p5 }
  0x49   : > { %p818_p2 = pnand %p817_p1, %p811_p0 }
  0x4b   : > { %821 = shalt.err (!%p818_p2)
}
  0x4c   : > { %701 = dma.hbm_to_vmem [thread:$0]  (!%p1042_p11), %s1049_s10, 384, %s1051_s7, %s165_s11  }
  0x4d   : > { %p1180_p7 = scmp.ne.s32.totalorder %s1175_s24, 0 }
  0x4e   : > { %s1081_s18 = sand.u32 (!%p1180_p7), 1, %s892_s13   ;;  %p1181_p3 = scmp.ne.s32.totalorder (!%p1180_p7), %s1173_s22, 0 }
  0x4f   : > { %187 = sbr.rel (%p1180_p7) target bundleno = 359 (0x167), region = 32  ;;  %s190_s25 = scalar_lea.sflag (!%p1180_p7), [#allocation3], %s1081_s18 }
  0x50   : > { %s685_s19 = smul.u32 (!%p1180_p7), 24, %s1081_s18 }
  0x52   : > { %s1085_s30 = scalar_lea.vmem (!%p1180_p7), [#allocation2], %s685_s19 }
  0x56   : > { %875 = dma.done.wait (%p1181_p3), %s190_s25, 384  }
  0x57   : > { %877 = vsyncadd (%p1181_p3), %s190_s25, 4294966912  ;;  %p1182_p11 = scmp.ne.s32.totalorder %s1171_s20, 0 }
  0x59   : > { %879 = dma.done.wait (%p1182_p11), [#allocation6], 6144  }
  0x5a   : > { %881 = vsyncadd (%p1182_p11), [#allocation6], 4294961152  ;;  %v914_v0 = vmov 0.0|0.0   ;;  %vm915_vm0 = vmmov 0   ;;  %v916_v1 = vmov 0.0   ;;  %v239_v2 = vld [vmem:[#allocation5 + $0x80] sm:$0xff] }
  0x5b   : > { %659 = vmatprep.subr.bf16.mxu1 %v914_v0  ;;  %624 = vmatprep.mubr.msk.f32.mxu1 %vm915_vm0, %v916_v1  ;;  %v240_v3 = vld [vmem:[#allocation5 + $0x88] sm:$0xff]  ;;  %v223_v4 = vld [vmem:[#allocation5] sm:$0xff]  ;;  %v241_v7 = vld [vmem:[#allocation5 + $0x90] sm:$0xff]  ;;  %s534_s20 = sshll.u32 %s1081_s18, 3  ;;  %s537_s7 = sshll.u32 %s900_s15, 7 }
  0x5c   : > { %v627_v5 = vpack.c.bf16 %v240_v3, %v239_v2  ;;  %v224_v6 = vld [vmem:[#allocation5 + $0x8] sm:$0xff]  ;;  %v242_v8 = vld [vmem:[#allocation5 + $0x98] sm:$0xff]  ;;  %v225_v11 = vld [vmem:[#allocation5 + $0x10] sm:$0xff]  ;;  %s219_s8 = scalar_lea.vmem [#allocation7], %s534_s20  ;;  %s1114_s26 = scalar_lea.hbm %s1166_s3, %s537_s7 }
  0x5d   : > { %v629_v9 = vpack.c.bf16 %v224_v6, %v223_v4  ;;  %v631_v10 = vpack.c.bf16 %v242_v8, %v241_v7  ;;  %v226_v12 = vld [vmem:[#allocation5 + $0x18] sm:$0xff]  ;;  %v255_v13 = vld [vmem:[#allocation5 + $0x100] sm:$0xff]  ;;  %v256_v14 = vld [vmem:[#allocation5 + $0x108] sm:$0xff]  ;;  %s434_s10 = sshll.u32 %s219_s8, 4  ;;  %s420_s27 = scalar_lea.sflag [#allocation4], %s1081_s18  ;;  %s1116_s10 = int_to_ptr.vmem [resolvable:$true] %s434_s10 }
  0x5e   : > { %628 = vmatprep.subr.bf16.mxu0 %v627_v5  ;;  %v243_v15 = vld [vmem:[#allocation5 + $0xa0] sm:$0xff]  ;;  %v244_v16 = vld [vmem:[#allocation5 + $0xa8] sm:$0xff]  ;;  %v633_v17 = vpack.c.bf16 %v226_v12, %v225_v11  ;;  %v660_v18 = vpack.c.bf16 %v256_v14, %v255_v13  ;;  %v257_v19 = vld [vmem:[#allocation5 + $0x110] sm:$0xff]  ;;  %s822_s6 = scalar_lea.vmem %s1116_s10, 128  ;;  %s917_s15 = smov [#allocation7]  }
  0x5f   : > { %630 = vmatpush3.bf16.msra.mxu0 %v629_v9  ;;  %v635_v20 = vpack.c.bf16 %v244_v16, %v243_v15  ;;  %v227_v21 = vld [vmem:[#allocation5 + $0x20] sm:$0xff]  ;;  %v228_v22 = vld [vmem:[#allocation5 + $0x28] sm:$0xff]  ;;  %v258_v23 = vld [vmem:[#allocation5 + $0x118] sm:$0xff]  ;;  %p823_p4 = scmp.ne.s32.totalorder %s1116_s10, %s822_s6  ;;  %s826_s9 = sshll.u32 %s917_s15, 4  ;;  %s827_s9 = int_to_ptr.vmem [resolvable:$false] %s826_s9 }
  0x60   : > { %632 = vmatprep.subr.bf16.mxu0 %v631_v10  ;;  %661 = vmatpush3.bf16.msra.mxu1 %v660_v18  ;;  %v663_v24 = vpack.c.bf16 %v258_v23, %v257_v19  ;;  %v245_v25 = vld [vmem:[#allocation5 + $0xb0] sm:$0xff]  ;;  %v246_v26 = vld [vmem:[#allocation5 + $0xb8] sm:$0xff]  ;;  %v259_v27 = vld [vmem:[#allocation5 + $0x120] sm:$0xff]  ;;  %v637_v29 = vpack.c.bf16 %v228_v22, %v227_v21  ;;  %s828_s21 = scalar_lea.vmem %s827_s9, 256  ;;  %p829_p12 = scmp.lt.s32.totalorder %s1116_s10, %s827_s9 }
  0x61   : > { %662 = vmatprep.subr.bf16.mxu1 %v914_v0  ;;  %v260_v28 = vld [vmem:[#allocation5 + $0x128] sm:$0xff]  ;;  %v639_v30 = vpack.c.bf16 %v246_v26, %v245_v25  ;;  %v229_v31 = vld [vmem:[#allocation5 + $0x30] sm:$0xff]  ;;  %v230_v32 = vld [vmem:[#allocation5 + $0x38] sm:$0xff]  ;;  %p824_p6 = pnand %p823_p4, %p1030_p10  ;;  %p830_p13 = scmp.lt.s32.totalorder %s828_s21, %s822_s6 }
  0x62   : > { %v666_v33 = vpack.c.bf16 %v260_v28, %v259_v27  ;;  %v247_v34 = vld [vmem:[#allocation5 + $0xc0] sm:$0xff]  ;;  %v248_v35 = vld [vmem:[#allocation5 + $0xc8] sm:$0xff]  ;;  %v261_v36 = vld [vmem:[#allocation5 + $0x130] sm:$0xff]  ;;  %v641_v38 = vpack.c.bf16 %v230_v32, %v229_v31 }
  0x63   : > { %634 = vmatpush3.bf16.msra.mxu0 %v633_v17  ;;  %v262_v37 = vld [vmem:[#allocation5 + $0x138] sm:$0xff]  ;;  %v643_v39 = vpack.c.bf16 %v248_v35, %v247_v34  ;;  %v231_v40 = vld [vmem:[#allocation5 + $0x40] sm:$0xff]  ;;  %v232_v41 = vld [vmem:[#allocation5 + $0x48] sm:$0xff]  ;;  %p825_p8 = pneg %p824_p6  ;;  %p831_p0 = por %p830_p13, %p829_p12 }
  0x64   : > { %636 = vmatprep.subr.bf16.mxu0 %v635_v20  ;;  %664 = vmatpush3.bf16.msra.mxu1 %v663_v24  ;;  %v669_v42 = vpack.c.bf16 %v262_v37, %v261_v36  ;;  %v249_v43 = vld [vmem:[#allocation5 + $0xd0] sm:$0xff]  ;;  %v250_v44 = vld [vmem:[#allocation5 + $0xd8] sm:$0xff]  ;;  %v263_v45 = vld [vmem:[#allocation5 + $0x140] sm:$0xff]  ;;  %v645_v48 = vpack.c.bf16 %v232_v41, %v231_v40 }
  0x65   : > { %665 = vmatprep.subr.bf16.mxu1 %v914_v0  ;;  %v264_v46 = vld [vmem:[#allocation5 + $0x148] sm:$0xff]  ;;  %v221_v47 = vld [vmem:[%s1085_s30 + $0x8] sm:$0xff]  ;;  %v647_v49 = vpack.c.bf16 %v250_v44, %v249_v43  ;;  %v251_v53 = vld [vmem:[#allocation5 + $0xe0] sm:$0xff]  ;;  %p832_p5 = pnand %p831_p0, %p825_p8 }
  0x66   : > { %342 = vmatprep.mubr.f32.mxu0 %v221_v47  ;;  %v233_v50 = vld [vmem:[#allocation5 + $0x50] sm:$0xff]  ;;  %v234_v51 = vld [vmem:[#allocation5 + $0x58] sm:$0xff]  ;;  %v672_v52 = vpack.c.bf16 %v264_v46, %v263_v45  ;;  %v252_v54 = vld [vmem:[#allocation5 + $0xe8] sm:$0xff] }
  0x67   : > { %638 = vmatpush3.bf16.msra.mxu0 %v637_v29  ;;  %v265_v55 = vld [vmem:[#allocation5 + $0x150] sm:$0xff]  ;;  %v266_v56 = vld [vmem:[#allocation5 + $0x158] sm:$0xff]  ;;  %v649_v57 = vpack.c.bf16 %v234_v51, %v233_v50  ;;  %v651_v58 = vpack.c.bf16 %v252_v54, %v251_v53  ;;  %v235_v59 = vld [vmem:[#allocation5 + $0x60] sm:$0xff] }
  0x68   : > { %640 = vmatprep.subr.bf16.mxu0 %v639_v30  ;;  %667 = vmatpush3.bf16.msra.mxu1 %v666_v33  ;;  %v236_v60 = vld [vmem:[#allocation5 + $0x68] sm:$0xff]  ;;  %v675_v61 = vpack.c.bf16 %v266_v56, %v265_v55  ;;  %v253_v62 = vld [vmem:[#allocation5 + $0xf0] sm:$0xff]  ;;  %v254_v63 = vld [vmem:[#allocation5 + $0xf8] sm:$0xff] }
  0x69   : > { %668 = vmatprep.subr.bf16.mxu1 %v914_v0  ;;  %v267_v1 = vld [vmem:[#allocation5 + $0x160] sm:$0xff]  ;;  %v268_v2 = vld [vmem:[#allocation5 + $0x168] sm:$0xff]  ;;  %v653_v3 = vpack.c.bf16 %v236_v60, %v235_v59  ;;  %v655_v4 = vpack.c.bf16 %v254_v63, %v253_v62  ;;  %v237_v5 = vld [vmem:[#allocation5 + $0x70] sm:$0xff] }
  0x6a   : > { %v238_v6 = vld [vmem:[#allocation5 + $0x78] sm:$0xff]  ;;  %v678_v7 = vpack.c.bf16 %v268_v2, %v267_v1  ;;  %v269_v8 = vld [vmem:[#allocation5 + $0x170] sm:$0xff] }
  0x6b   : > { %642 = vmatpush3.bf16.msra.mxu0 %v641_v38  ;;  %v270_v9 = vld [vmem:[#allocation5 + $0x178] sm:$0xff]  ;;  %v657_v10 = vpack.c.bf16 %v238_v6, %v237_v5  ;;  %v220_v12 = vld [vmem:[%s1085_s30] sm:$0xff] }
  0x6c   : > { %644 = vmatprep.subr.bf16.mxu0 %v643_v39  ;;  %670 = vmatpush3.bf16.msra.mxu1 %v669_v42  ;;  %v681_v11 = vpack.c.bf16 %v270_v9, %v269_v8  ;;  %v222_v13 = vld [vmem:[%s1085_s30 + $0x10] sm:$0xff]  ;;  %v535_v16 = vld [vmem:[%s1165_s2] ss:$0 sm:$0xff] }
  0x6d   : > { %671 = vmatprep.subr.bf16.mxu1 %v914_v0 }
  0x6f   : > { %646 = vmatpush3.bf16.msra.mxu0 %v645_v48 }
  0x70   : > { %648 = vmatprep.subr.bf16.mxu0 %v647_v49  ;;  %673 = vmatpush3.bf16.msra.mxu1 %v672_v52 }
  0x71   : > { %674 = vmatprep.subr.bf16.mxu1 %v914_v0 }
  0x73   : > { %650 = vmatpush3.bf16.msra.mxu0 %v649_v57 }
  0x74   : > { %652 = vmatprep.subr.bf16.mxu0 %v651_v58  ;;  %676 = vmatpush3.bf16.msra.mxu1 %v675_v61 }
  0x75   : > { %677 = vmatprep.subr.bf16.mxu1 %v914_v0 }
  0x77   : > { %654 = vmatpush3.bf16.msra.mxu0 %v653_v3 }
  0x78   : > { %656 = vmatprep.subr.bf16.mxu0 %v655_v4  ;;  %679 = vmatpush3.bf16.msra.mxu1 %v678_v7 }
  0x79   : > { %680 = vmatprep.subr.bf16.mxu1 %v914_v0 }
  0x7b   : > { %658 = vmatpush3.bf16.msra.mxu0 %v657_v10 }
  0x7c   : > { %682 = vmatpush3.bf16.msra.mxu1 %v681_v11 }
  0x7e   : > { %343 = vmatmul.mubr.f32.vlgmr.msra.gmra.mrb[0].mxu0 %v220_v12 }
  0x7f   : > { %625 = vmatmul.mubr.f32.vlgmr.msra.gmra.mrb[0].mxu1 %v222_v13 }
 0x151   : > { %v572_v14 = vpop.f32.mrb[0].mxu0 }
 0x152   : > { %v573_v15 = vpop.f32.mrb[1].mxu0  ;;  %v414_v18 = vpop.f32.mrb[0].mxu1 }
 0x153   : > { %v574_v17 = vadd.f32 %v573_v15, %v572_v14  ;;  %v626_v19 = vpop.f32.mrb[1].mxu1 }
 0x155   : > { %v345_v0 = vadd.f32 %v574_v17, %v535_v16 }
 0x157   : > { %v415_v20 = vadd.f32 %v414_v18, %v345_v0 }
 0x159   : > { %418 = vst [vmem:[%s219_s8] sm:$0xff] %v415_v20 }
 0x15a   : > { %835 = shalt.err (!%p832_p5)
}
 0x15b   : > { %s836_s18 = scalar_lea.hbm %s1114_s26, 128  ;;  %s840_s30 = scalar_lea.hbm %s1166_s3, 256 }
 0x15c   : > { %p837_p9 = scmp.ne.s32.totalorder %s1114_s26, %s836_s18  ;;  %p841_p7 = scmp.lt.u32.totalorder %s1114_s26, %s1166_s3 }
 0x15d   : > { %p842_p3 = scmp.lt.u32.totalorder %s840_s30, %s836_s18  ;;  %p844_p4 = scmp.lt.u32.totalorder %s836_s18, %s1114_s26 }
 0x15e   : > { %p838_p1 = pnand %p837_p9, %p1030_p10 }
 0x15f   : > { %p843_p11 = por %p842_p3, %p841_p7 }
 0x160   : > { %p839_p2 = pneg %p838_p1 }
 0x161   : > { %p845_p6 = por %p844_p4, %p843_p11 }
 0x163   : > { %p846_p8 = pnand %p845_p6, %p839_p2 }
 0x165   : > { %849 = shalt.err (!%p846_p8)
}
 0x166   : > { %692 = dma.vmem_to_hbm [thread:$0]  (%p1030_p10), %s1116_s10, 128, %s1114_s26, %s420_s27  }
 0x167 PF: > { %s446_s24 = sand.u32 1, %s888_s12   ;;  %p1183_p12 = scmp.ne.s32.totalorder %s1174_s23, 0 }
 0x168   : > { %p1184_p13 = scmp.ge.s32.totalorder %s908_s17, 2  ;;  %s447_s7 = scalar_lea.sflag [#allocation4], %s446_s24 }
 0x16a   : > { %p703_p0 = pnand %p1184_p13, %p1183_p12 }
 0x16c   : > { %883 = dma.done.wait (!%p703_p0), %s447_s7, 128  }
 0x16d   : > { %885 = vsyncadd (!%p703_p0), %s447_s7, 4294967168  ;;  %s20_s17 = sadd.s32 1, %s908_s17   ;;  %s1185_s12 = smov %s892_s13 }
 0x16e   : > { %p17_p5 = scmp.ge.s32.totalorder %s20_s17, 4   ;;  %s1186_s13 = smov %s896_s14 }
 0x16f   : > { %s1187_s14 = smov %s1039_s5  ;;  %s1188_s15 = smov %s904_s16 }
 0x170   : > { %s1189_s16 = smov %s1191_s28  ;;  %19 = sbr.rel (!%p17_p5) target bundleno = 7 (0x7), region = 81 }
 0x177   :  { %452 = vsyncpa [#allocation3], 1 }
 0x178   :  { %454 = vsyncpa [#allocation3 + $0x1], 1 }
 0x179   :  { %455 = vsyncpa [#allocation6], 1 }
 0x17a   :  { %456 = vsyncpa [#allocation4], 1 }
 0x17b   :  { %458 = vsyncpa [#allocation4 + $0x1], 1 }

</bundles_post_ra>
